<compile_context>
chip_gen: v7x
topology: tpu7x:2x2x1
jax: 0.10.0
libtpu: 0.0.40
codegen_flags: <defaults>
</compile_context>

<pallas_src>
import jax
import jax.numpy as jnp
from jax import lax
from jax.experimental import pallas as pl
from jax.experimental.pallas import tpu as pltpu


def _label_embed_kernel(idx_ref, table_ref, pos_ref, out_ref):
    # idx_ref:   [N, 1]  int32   (N = B*L flattened tokens, batch-major)
    # table_ref: [V, H]  float32 (full embedding table, resident in VMEM)
    # pos_ref:   [L, H]  float32 (position embeddings, already sliced to L)
    # out_ref:   [N, H]  float32
    N = idx_ref.shape[0]
    V = table_ref.shape[0]
    L = pos_ref.shape[0]
    B = N // L

    # One-hot gather via MXU in native orientation:
    #   onehot[n, v] = (v == idx[n]);  emb[n, h] = sum_v onehot[n, v] * table[v, h]
    ids = idx_ref[...]                                           # [N, 1]
    vocab_iota = lax.broadcasted_iota(jnp.int32, (N, V), 1)      # [N, V]
    onehot = (vocab_iota == ids).astype(jnp.float32)             # [N, V]

    emb = jnp.dot(onehot, table_ref[...],
                  preferred_element_type=jnp.float32)            # [N, H]

    # Broadcast position embeddings across the batch (token n uses pos row n % L,
    # which for batch-major flattening is exactly a B-fold tile along sublanes).
    pos_full = jnp.tile(pos_ref[...], (B, 1))                    # [N, H]

    # Dropout is identity at inference time.
    # TODO(synk): training-mode dropout would use pltpu.prng_seed/prng_random_bits.
    out_ref[...] = (emb + pos_full).astype(out_ref.dtype)


def label_embeddings(indices, emb_table, pos_emb):
    """indices: [B, L] int, emb_table: [V, H] f32, pos_emb: [1, P, H] f32 (P >= L)."""
    B, L = indices.shape
    V, H = emb_table.shape
    N = B * L

    idx2d = indices.reshape(N, 1).astype(jnp.int32)   # batch-major flatten
    pos = pos_emb[0, :L, :]                           # slice position_embeddings[:, 0:L, :]

    out2d = pl.pallas_call(
        _label_embed_kernel,
        out_shape=jax.ShapeDtypeStruct((N, H), jnp.float32),
        grid_spec=pltpu.PrefetchScalarGridSpec(
            num_scalar_prefetch=0,
            grid=(1,),                                     # single step: whole problem fits VMEM
            in_specs=[
                pl.BlockSpec((N, 1), lambda i: (0, 0)),    # all token ids
                pl.BlockSpec((V, H), lambda i: (0, 0)),    # full table
                pl.BlockSpec((L, H), lambda i: (0, 0)),    # full pos emb
            ],
            out_specs=pl.BlockSpec((N, H), lambda i: (0, 0)),
        ),
        compiler_params=pltpu.CompilerParams(
            dimension_semantics=("arbitrary",)),
    )(idx2d, emb_table, pos)

    return out2d.reshape(B, L, H)


if __name__ == "__main__":
    # config: num_labels (vocab) = 16, hidden_size = 32, label_level = 8
    B, L, V, H = 2, 8, 16, 32

    key = jax.random.PRNGKey(0)
    k_idx, k_tab, k_pos = jax.random.split(key, 3)

    indices = jax.random.randint(k_idx, (B, L), 0, V, dtype=jnp.int32)
    # nn.Embedding default init ~ N(0, 1)
    emb_table = jax.random.normal(k_tab, (V, H), dtype=jnp.float32)
    # Module inits position_embeddings to zeros; use a small deterministic
    # nonzero tensor here so the add path is actually exercised.
    pos_emb = 0.01 * jax.random.normal(k_pos, (1, L, H), dtype=jnp.float32)

    out = label_embeddings(indices, emb_table, pos_emb)
    out = jax.block_until_ready(out)

    # Pure-JAX reference (dropout is identity in eval mode).
    ref = jnp.take(emb_table, indices, axis=0) + pos_emb[:, :L, :]
    assert out.shape == (B, L, H)
    assert jnp.allclose(out, ref, atol=1e-5, rtol=1e-5)

    print("KERNEL_OK")
</pallas_src>

<mosaic_0001>
module attributes {stable_mosaic.version = 11 : i64} {
  func.func @_label_embed_kernel(%arg0: i32, %arg1: memref<16x1xi32, #tpu.memory_space<vmem>>, %arg2: memref<16x32xf32, #tpu.memory_space<vmem>>, %arg3: memref<8x32xf32, #tpu.memory_space<vmem>>, %arg4: memref<16x32xf32, #tpu.memory_space<vmem>>) attributes {dimension_semantics = [#tpu.dimension_semantics<arbitrary>], iteration_bounds = array<i64: 1>, scalar_prefetch = 0 : i64, scratch_operands = 0 : i64, tpu.core_type = #tpu.core_type<tc>, window_params = [{pipeline_mode = #tpu.pipeline_mode<synchronous>, transform_indices = @transform_0, window_bounds = array<i64: 16, 1>}, {pipeline_mode = #tpu.pipeline_mode<synchronous>, transform_indices = @transform_1, window_bounds = array<i64: 16, 32>}, {pipeline_mode = #tpu.pipeline_mode<synchronous>, transform_indices = @transform_2, window_bounds = array<i64: 8, 32>}, {pipeline_mode = #tpu.pipeline_mode<synchronous>, transform_indices = @transform_3, window_bounds = array<i64: 16, 32>}]} {
    %c0 = arith.constant 0 : index
    %c0_0 = arith.constant 0 : index
    %0 = vector.load %arg1[%c0, %c0_0] : memref<16x1xi32, #tpu.memory_space<vmem>>, vector<16x1xi32>
    %1 = tpu.iota {dimensions = array<i32: 1>} : vector<16x16xi32>
    %2 = vector.broadcast %0 : vector<16x1xi32> to vector<16x16xi32>
    %3 = arith.cmpi eq, %1, %2 : vector<16x16xi32>
    %4 = arith.extui %3 : vector<16x16xi1> to vector<16x16xi32>
    %5 = arith.sitofp %4 : vector<16x16xi32> to vector<16x16xf32>
    %c0_1 = arith.constant 0 : index
    %c0_2 = arith.constant 0 : index
    %6 = vector.load %arg2[%c0_1, %c0_2] : memref<16x32xf32, #tpu.memory_space<vmem>>, vector<16x32xf32>
    %cst = arith.constant dense<0.000000e+00> : vector<16x32xf32>
    %7 = tpu.matmul %5, %6, %cst {dimension_numbers = #tpu.dot_dimension_numbers<[1], [0], [0], [1], [0, 0, 1, 1], [], []>} : vector<16x16xf32>, vector<16x32xf32>, vector<16x32xf32> -> vector<16x32xf32>
    %c0_3 = arith.constant 0 : index
    %c0_4 = arith.constant 0 : index
    %8 = vector.load %arg3[%c0_3, %c0_4] : memref<8x32xf32, #tpu.memory_space<vmem>>, vector<8x32xf32>
    %9 = tpu.concatenate %8, %8 in 0 : vector<8x32xf32>, vector<8x32xf32> -> vector<16x32xf32>
    %10 = arith.addf %7, %9 : vector<16x32xf32>
    %c0_5 = arith.constant 0 : index
    %c0_6 = arith.constant 0 : index
    %11 = vector.load %arg4[%c0_5, %c0_6] : memref<16x32xf32, #tpu.memory_space<vmem>>, vector<16x32xf32>
    tpu.vector_store %arg4[%c0_5, %c0_6], %10 {strides = array<i32>} : memref<16x32xf32, #tpu.memory_space<vmem>>, vector<16x32xf32>,
    return
  }
  func.func @transform_0(%arg0: i32) -> (i32, i32) {
    %c0_i32 = arith.constant 0 : i32
    %c0_i32_0 = arith.constant 0 : i32
    %c0_i32_1 = arith.constant 0 : i32
    return %c0_i32, %c0_i32_0 : i32, i32
  }
  func.func @transform_1(%arg0: i32) -> (i32, i32) {
    %c0_i32 = arith.constant 0 : i32
    %c0_i32_0 = arith.constant 0 : i32
    %c0_i32_1 = arith.constant 0 : i32
    return %c0_i32, %c0_i32_0 : i32, i32
  }
  func.func @transform_2(%arg0: i32) -> (i32, i32) {
    %c0_i32 = arith.constant 0 : i32
    %c0_i32_0 = arith.constant 0 : i32
    %c0_i32_1 = arith.constant 0 : i32
    return %c0_i32, %c0_i32_0 : i32, i32
  }
  func.func @transform_3(%arg0: i32) -> (i32, i32) {
    %c0_i32 = arith.constant 0 : i32
    %c0_i32_0 = arith.constant 0 : i32
    %c0_i32_1 = arith.constant 0 : i32
    return %c0_i32, %c0_i32_0 : i32, i32
  }
}

</mosaic_0001>

<bundles_post_ra>
// kernel: tpu_custom_call.1
= control target key start
LH: loop header
LB: loop body
LE: loop exit
PB: predicated region body
PF: predicated region fallthrough
CT: control target
= control target key end

     0   :  { %s236_s0 = inlined_call_operand.vmem [shape: s32[16,1], index: 0, kind: input, shape index: {}]   ;;  %s237_s1 = inlined_call_operand.vmem [shape: f32[16,32], index: 1, kind: input, shape index: {}]   ;;  %s238_s2 = inlined_call_operand.vmem [shape: f32[8,32], index: 2, kind: input, shape index: {}]   ;;  %s239_s3 = inlined_call_operand.hbm [shape: f32[16,32], index: 3, kind: output, shape index: {}]  }
   0x1   :  { %v15_v0 = vld [vmem:[%s236_s0] sm:$0xff] }
   0x2   :  { %8 = vsyncpa [#allocation3], 0  ;;  %v184_v1 = vmov 0   ;;  %v31_v2 = vld [vmem:[%s237_s1] sm:$0xff]  ;;  %v32_v3 = vld [vmem:[%s237_s1 + $0x8] sm:$0xff]  ;;  %v17_v6 = vlaneseq  ;;  %vm34_vm0 = vcmask 130048  }
   0x3   :  { %159 = vset.pattern.permute.xlu0 %v184_v1  ;;  %v150_v4 = vpack.c.bf16 %v32_v3, %v31_v2  ;;  %v16_v5 = vld [vmem:[%s236_s0 + $0x8] sm:$0xff]  ;;  %v185_v9 = vmov 0.0   ;;  %v33_v13 = vld [vmem:[%s238_s2] sm:$0xff]  ;;  %s186_s0 = smov [#allocation2]   ;;  %vm116_vm3 = vcmask 261120  }
   0x4   :  { %20 = vperm.xlu0 %159, %v15_v0   ;;  %v18_v7 = vand.u32 127, %v17_v6  ;;  %s124_s21 = sshll.u32 %s186_s0, 4  ;;  %s125_s21 = int_to_ptr.vmem [resolvable:$true] %s124_s21 }
   0x5   :  { %151 = vmatprep.subr.bf16.mxu0 %v150_v4  ;;  %s160_s22 = scalar_lea.vmem %s125_s21, 256  ;;  %p165_p1 = scmp.lt.s32.totalorder %s125_s21, %s125_s21 }
   0x6   :  { %153 = vmatpush3.bf16.msra.mxu0 %v150_v4  ;;  %p161_p0 = scmp.ne.s32.totalorder %s125_s21, %s160_s22  ;;  %p166_p2 = scmp.lt.s32.totalorder %s160_s22, %s160_s22 }
   0x8   :  { %23 = vperm.xlu0 %159, %v16_v5   ;;  %p167_p3 = por %p166_p2, %p165_p1 }
   0xa   :  { %p168_p4 = pnand %p167_p3, %p161_p0 }
  0x83   :  { %v21_v8 = vpop.permute.xlu0 %20 }
  0x84   :  { %vm25_vm1 = vcmp.eq.s32.totalorder %v18_v7, %v21_v8 }
  0x85   :  { %v135_v10 = vsel %vm25_vm1, 1.0, %v185_v9 }
  0x86   :  { %147 = vmatprep.mubr.msk.f32.mxu0 %vm34_vm0, %v135_v10 }
  0x87   :  { %v24_v11 = vpop.permute.xlu0 %23 }
  0x88   :  { %vm26_vm2 = vcmp.eq.s32.totalorder %v18_v7, %v24_v11 }
  0x89   :  { %v136_v12 = vsel %vm26_vm2, 1.0, %v185_v9 }
  0x8a   :  { %148 = vmatmul.mubr.msk.f32.vlgmr.msra.gmra.mrb[0].mxu0 %vm34_vm0, %v136_v12 }
 0x15d   :  { %v149_v14 = vpop.f32.mrb[0].mxu0 }
 0x15e   :  { %v113_v15 = vadd.f32 %v149_v14, %v33_v13  ;;  %v107_v16 = vpop.f32.mrb[1].mxu0 }
 0x15f   :  { %v108_v17 = vadd.f32 %v107_v16, %v33_v13 }
 0x160   :  { %118 = vst.msk [vmem:[#allocation2 + $0x8] sm:$0xff] %vm116_vm3, %v113_v15 }
 0x161   :  { %117 = vst.msk [vmem:[#allocation2] sm:$0xff] %vm116_vm3, %v108_v17 }
 0x162   :  { %171 = shalt.err (!%p168_p4)
}
 0x163   :  { %s172_s2 = scalar_lea.hbm %s239_s3, 256 }
 0x164   :  { %p173_p5 = scmp.ne.s32.totalorder %s239_s3, %s172_s2  ;;  %p176_p6 = scmp.lt.u32.totalorder %s172_s2, %s239_s3 }
 0x166   :  { %p178_p7 = pnand %p176_p6, %p173_p5 }
 0x168   :  { %181 = shalt.err (!%p178_p7)
}
 0x169   :  { %s187_s29 = smov 128   ;;  %s188_s30 = smov 8  }
 0x16a   :  { %130 = dma.vmem_to_hbm [thread:$0]  %s125_s21, 256, %s239_s3, [#allocation3], %s187_s29, %s187_s29, %s188_s30  }
 0x16b   :  { %182 = dma.done.wait [#allocation3], 256  }
 0x16c   :  { %183 = vsyncadd [#allocation3], 4294967040 }
 0x16d   :  { %134 = vsyncpa [#allocation3], 1 }

</bundles_post_ra>
